<compile_context>
chip_gen: v6e
topology: v6e:2x2x1
jax: 0.10.0
libtpu: 0.0.40
codegen_flags: <defaults>
</compile_context>

<pallas_src>
import jax
import jax.numpy as jnp
from jax.experimental import pallas as pl
from jax.experimental.pallas import tpu as pltpu


def _round_up(x: int, m: int) -> int:
    return ((x + m - 1) // m) * m


def _linear_kernel_kernel(x_ref, y_ref, o_ref, acc_ref):
    """One (tn, tm) output tile, accumulated over the d (k) grid axis.

    x_ref: (tk, tn), y_ref: (tk, tm), o_ref: (tn, tm), acc_ref: (tn, tm) f32.
    """
    k = pl.program_id(2)

    @pl.when(k == 0)
    def _():
        acc_ref[...] = jnp.zeros_like(acc_ref)

    # Contract over dim 0 of both operands (the feature dim d). No explicit
    # transpose: Mosaic feeds the transposed-LHS matmul directly to the MXU.
    acc_ref[...] += jax.lax.dot_general(
        x_ref[...],
        y_ref[...],
        dimension_numbers=(((0,), (0,)), ((), ())),
        preferred_element_type=jnp.float32,
    )

    @pl.when(k == pl.num_programs(2) - 1)
    def _():
        o_ref[...] = acc_ref[...].astype(o_ref.dtype)


def linear_kernel(X, Y=None, *, tile_n=512, tile_m=512, tile_k=512):
    """Computes the (N, M) linear kernel matrix K = X^T Y.

    X: (d, N), Y: (d, M). If Y is None, Y = X.
    Tile defaults (512) keep the double-buffered footprint ~a few MiB, well
    inside the scoped-VMEM limits of v5e/v6e/v7x while amortizing per-step
    overhead; pass smaller tiles for v5e if desired.
    """
    if Y is None:
        # TODO(synk): exploit symmetry (triangular grid skip) for the Gram
        # matrix case instead of passing X twice.
        Y = X
    if X.ndim == 1:
        X = X[:, None]
    if Y.ndim == 1:
        Y = Y[:, None]

    d, N = X.shape
    d2, M = Y.shape
    assert d == d2, "feature dimensions must match"

    out_dtype = jnp.promote_types(X.dtype, Y.dtype)
    X = X.astype(out_dtype)
    Y = Y.astype(out_dtype)

    # Sublane alignment for the d (second-to-last) block dim per dtype packing.
    itemsize = jnp.dtype(out_dtype).itemsize
    sub_align = {4: 8, 2: 16, 1: 32}.get(itemsize, 8)

    # Clamp tile sizes to the (aligned) problem size so small problems use a
    # single lane-dense tile; then pad arrays up to tile multiples so the
    # (8, 128) block constraint is always satisfied.
    tn = min(tile_n, _round_up(N, 128))
    tm = min(tile_m, _round_up(M, 128))
    tk = min(tile_k, _round_up(d, sub_align))

    n_pad = _round_up(N, tn)
    m_pad = _round_up(M, tm)
    d_pad = _round_up(d, tk)

    if (d_pad, n_pad) != (d, N):
        X = jnp.pad(X, ((0, d_pad - d), (0, n_pad - N)))
    if (d_pad, m_pad) != (d, M):
        Y = jnp.pad(Y, ((0, d_pad - d), (0, m_pad - M)))

    grid = (n_pad // tn, m_pad // tm, d_pad // tk)

    cost = pl.CostEstimate(
        flops=2 * d_pad * n_pad * m_pad,
        transcendentals=0,
        bytes_accessed=(X.size + Y.size + n_pad * m_pad) * itemsize,
    )

    out = pl.pallas_call(
        _linear_kernel_kernel,
        out_shape=jax.ShapeDtypeStruct((n_pad, m_pad), out_dtype),
        grid_spec=pltpu.PrefetchScalarGridSpec(
            num_scalar_prefetch=0,
            grid=grid,
            in_specs=[
                pl.BlockSpec((tk, tn), lambda i, j, k: (k, i)),  # X tile
                pl.BlockSpec((tk, tm), lambda i, j, k: (k, j)),  # Y tile
            ],
            out_specs=pl.BlockSpec((tn, tm), lambda i, j, k: (i, j)),
            scratch_shapes=[pltpu.VMEM((tn, tm), jnp.float32)],
        ),
        compiler_params=pltpu.CompilerParams(
            dimension_semantics=("parallel", "parallel", "arbitrary"),
        ),
        cost_estimate=cost,
    )(X, Y)

    if (n_pad, m_pad) != (N, M):
        out = out[:N, :M]
    return out


if __name__ == "__main__":
    key = jax.random.PRNGKey(0)
    kx, ky, kbx, kby = jax.random.split(key, 4)

    # Small shapes matching the module's convention (d x N, d x M).
    d, N, M = 32, 16, 8
    X = jax.random.normal(kx, (d, N), dtype=jnp.float32)
    Y = jax.random.normal(ky, (d, M), dtype=jnp.float32)

    K_xy = jax.block_until_ready(linear_kernel(X, Y))   # (N, M)
    K_xx = jax.block_until_ready(linear_kernel(X))      # (N, N), Y defaults to X

    ref_xy = X.T @ Y
    ref_xx = X.T @ X
    assert K_xy.shape == (N, M)
    assert K_xx.shape == (N, N)
    assert jnp.allclose(K_xy, ref_xy, atol=1e-4, rtol=1e-4)
    assert jnp.allclose(K_xx, ref_xx, atol=1e-4, rtol=1e-4)

    # Second check that exercises a multi-tile grid (incl. the k reduction
    # axis, accumulator init/finalize, and padding/slicing).
    d2, N2, M2 = 300, 300, 200
    Xb = jax.random.normal(kbx, (d2, N2), dtype=jnp.float32)
    Yb = jax.random.normal(kby, (d2, M2), dtype=jnp.float32)
    K_big = jax.block_until_ready(
        linear_kernel(Xb, Yb, tile_n=128, tile_m=128, tile_k=128)
    )
    ref_big = Xb.T @ Yb
    assert K_big.shape == (N2, M2)
    assert jnp.allclose(K_big, ref_big, atol=1e-3, rtol=1e-3)

    print("KERNEL_OK")
</pallas_src>

<mosaic_0001>
module attributes {stable_mosaic.version = 11 : i64} {
  func.func @_linear_kernel_kernel(%arg0: i32, %arg1: i32, %arg2: i32, %arg3: memref<32x128xf32, #tpu.memory_space<vmem>>, %arg4: memref<32x128xf32, #tpu.memory_space<vmem>>, %arg5: memref<128x128xf32, #tpu.memory_space<vmem>>, %arg6: memref<128x128xf32, #tpu.memory_space<vmem>>) attributes {dimension_semantics = [#tpu.dimension_semantics<parallel>, #tpu.dimension_semantics<parallel>, #tpu.dimension_semantics<arbitrary>], iteration_bounds = array<i64: 1, 1, 1>, scalar_prefetch = 0 : i64, scratch_operands = 1 : i64, tpu.core_type = #tpu.core_type<tc>, window_params = [{transform_indices = @transform_0, window_bounds = array<i64: 32, 128>}, {transform_indices = @transform_1, window_bounds = array<i64: 32, 128>}, {transform_indices = @transform_2, window_bounds = array<i64: 128, 128>}]} {
    %c0_i32 = arith.constant 0 : i32
    %0 = arith.cmpi eq, %arg2, %c0_i32 : i32
    %1 = arith.extui %0 : i1 to i32
    %c0_i32_0 = arith.constant 0 : i32
    %2 = arith.cmpi ne, %1, %c0_i32_0 : i32
    scf.if %2 {
      %cst_10 = arith.constant 0.000000e+00 : f32
      %12 = vector.broadcast %cst_10 : f32 to vector<128x128xf32>
      %c0_11 = arith.constant 0 : index
      %c0_12 = arith.constant 0 : index
      %13 = vector.load %arg6[%c0_11, %c0_12] : memref<128x128xf32, #tpu.memory_space<vmem>>, vector<128x128xf32>
      tpu.vector_store %arg6[%c0_11, %c0_12], %12 {strides = array<i32>} : memref<128x128xf32, #tpu.memory_space<vmem>>, vector<128x128xf32>,
    } else {
    }
    %c0 = arith.constant 0 : index
    %c0_1 = arith.constant 0 : index
    %3 = vector.load %arg6[%c0, %c0_1] : memref<128x128xf32, #tpu.memory_space<vmem>>, vector<128x128xf32>
    %c0_2 = arith.constant 0 : index
    %c0_3 = arith.constant 0 : index
    %4 = vector.load %arg3[%c0_2, %c0_3] : memref<32x128xf32, #tpu.memory_space<vmem>>, vector<32x128xf32>
    %c0_4 = arith.constant 0 : index
    %c0_5 = arith.constant 0 : index
    %5 = vector.load %arg4[%c0_4, %c0_5] : memref<32x128xf32, #tpu.memory_space<vmem>>, vector<32x128xf32>
    %cst = arith.constant dense<0.000000e+00> : vector<128x128xf32>
    %6 = tpu.matmul %4, %5, %cst {dimension_numbers = #tpu.dot_dimension_numbers<[0], [0], [1], [1], [0, 1, 1, 1], [], []>} : vector<32x128xf32>, vector<32x128xf32>, vector<128x128xf32> -> vector<128x128xf32>
    %7 = arith.addf %3, %6 : vector<128x128xf32>
    %c0_6 = arith.constant 0 : index
    %c0_7 = arith.constant 0 : index
    %8 = vector.load %arg6[%c0_6, %c0_7] : memref<128x128xf32, #tpu.memory_space<vmem>>, vector<128x128xf32>
    tpu.vector_store %arg6[%c0_6, %c0_7], %7 {strides = array<i32>} : memref<128x128xf32, #tpu.memory_space<vmem>>, vector<128x128xf32>,
    %c0_i32_8 = arith.constant 0 : i32
    %9 = arith.cmpi eq, %arg2, %c0_i32_8 : i32
    %10 = arith.extui %9 : i1 to i32
    %c0_i32_9 = arith.constant 0 : i32
    %11 = arith.cmpi ne, %10, %c0_i32_9 : i32
    scf.if %11 {
      %c0_10 = arith.constant 0 : index
      %c0_11 = arith.constant 0 : index
      %12 = vector.load %arg6[%c0_10, %c0_11] : memref<128x128xf32, #tpu.memory_space<vmem>>, vector<128x128xf32>
      %c0_12 = arith.constant 0 : index
      %c0_13 = arith.constant 0 : index
      %13 = vector.load %arg5[%c0_12, %c0_13] : memref<128x128xf32, #tpu.memory_space<vmem>>, vector<128x128xf32>
      tpu.vector_store %arg5[%c0_12, %c0_13], %12 {strides = array<i32>} : memref<128x128xf32, #tpu.memory_space<vmem>>, vector<128x128xf32>,
    } else {
    }
    return
  }
  func.func @transform_0(%arg0: i32, %arg1: i32, %arg2: i32) -> (i32, i32) {
    %c0_i32 = arith.constant 0 : i32
    return %arg2, %arg0 : i32, i32
  }
  func.func @transform_1(%arg0: i32, %arg1: i32, %arg2: i32) -> (i32, i32) {
    %c0_i32 = arith.constant 0 : i32
    return %arg2, %arg1 : i32, i32
  }
  func.func @transform_2(%arg0: i32, %arg1: i32, %arg2: i32) -> (i32, i32) {
    %c0_i32 = arith.constant 0 : i32
    return %arg0, %arg1 : i32, i32
  }
}

</mosaic_0001>

<bundles_post_ra>
// kernel: tpu_custom_call.1
= control target key start
LH: loop header
LB: loop body
LE: loop exit
PB: predicated region body
PF: predicated region fallthrough
CT: control target
= control target key end

     0   :  { %7 = vsyncpa [#allocation4], 0  ;;  %s597_s0 = inlined_call_operand.hbm [shape: f32[32,128], index: 0, kind: input, shape index: {}]   ;;  %s598_s1 = inlined_call_operand.hbm [shape: f32[32,128], index: 1, kind: input, shape index: {}]   ;;  %s599_s2 = inlined_call_operand.hbm [shape: f32[128,128], index: 2, kind: output, shape index: {}]  }
   0x1   :  { %8 = vsyncpa [#allocation7], 0 }
   0x2   :  { %9 = vsyncpa [#allocation5], 0  ;;  %s543_s9 = smov [#allocation3]  }
   0x3   :  { %s15_s10 = sshll.u32 %s543_s9, 4  ;;  %s16_s10 = int_to_ptr.vmem [resolvable:$true] %s15_s10 }
   0x4   :  { %s485_s11 = scalar_lea.vmem %s16_s10, 512  ;;  %p490_p1 = scmp.lt.s32.totalorder %s16_s10, %s16_s10 }
   0x5   :  { %p486_p0 = scmp.ne.s32.totalorder %s16_s10, %s485_s11  ;;  %p491_p2 = scmp.lt.s32.totalorder %s485_s11, %s485_s11 }
   0x7   :  { %p492_p3 = por %p491_p2, %p490_p1 }
   0x9   :  { %p493_p4 = pnand %p492_p3, %p486_p0 }
   0xb   :  { %496 = shalt.err (!%p493_p4)
}
   0xc   :  { %s544_s12 = smov 128   ;;  %s545_s13 = smov 8  }
   0xd   :  { %21 = dma.hbm_to_vmem [thread:$0]  %s597_s0, 512, %s16_s10, [#allocation4], %s544_s12, %s544_s12, %s545_s13  }
   0xe   :  { %s546_s16 = smov [#allocation6]  }
   0xf   :  { %s27_s17 = sshll.u32 %s546_s16, 4  ;;  %s28_s17 = int_to_ptr.vmem [resolvable:$true] %s27_s17 }
  0x10   :  { %s505_s18 = scalar_lea.vmem %s28_s17, 512  ;;  %p510_p6 = scmp.lt.s32.totalorder %s28_s17, %s28_s17 }
  0x11   :  { %p506_p5 = scmp.ne.s32.totalorder %s28_s17, %s505_s18  ;;  %p511_p7 = scmp.lt.s32.totalorder %s505_s18, %s505_s18 }
  0x13   :  { %p512_p8 = por %p511_p7, %p510_p6 }
  0x15   :  { %p513_p9 = pnand %p512_p8, %p506_p5 }
  0x17   :  { %516 = shalt.err (!%p513_p9)
}
  0x18   :  { %33 = dma.hbm_to_vmem [thread:$0]  %s598_s1, 512, %s28_s17, [#allocation7], %s544_s12, %s544_s12, %s545_s13  }
  0x19   :  { %537 = dma.done.wait [#allocation4], 512  }
  0x1a   :  { %538 = vsyncadd [#allocation4], 4294966784 }
  0x1b   :  { %539 = dma.done.wait [#allocation7], 512  }
  0x1c   :  { %540 = vsyncadd [#allocation7], 4294966784  ;;  %v76_v0 = vld [vmem:[#allocation3] sm:$0xff]  ;;  %v83_v1 = vld [vmem:[#allocation6 + $0x18] sm:$0xff]  ;;  %vm116_vm0 = vcmask 261120   ;;  %s547_s0 = smov [#allocation8]  }
  0x1d   :  { %84 = vxpose.xlu0.b32.start [1/4] (short) %v76_v0, 128  ;;  %v82_v2 = vld [vmem:[#allocation6 + $0x10] sm:$0xff]  ;;  %v77_v3 = vld [vmem:[#allocation3 + $0x8] sm:$0xff]  ;;  %431 = vmatprep.subr.mxu0 %v83_v1  ;;  %v80_v5 = vld [vmem:[#allocation6] sm:$0xff]  ;;  %s382_s1 = sshll.u32 %s547_s0, 4  ;;  %s383_s1 = int_to_ptr.vmem [resolvable:$true] %s382_s1 }
  0x1e   :  { %463 = vmatprep.subr.mxu1 %v83_v1  ;;  %432 = vmatpush3.msra.mxu0 %v83_v1  ;;  %v81_v4 = vld [vmem:[#allocation6 + $0x8] sm:$0xff]  ;;  %v78_v6 = vld [vmem:[#allocation3 + $0x10] sm:$0xff]  ;;  %v79_v7 = vld [vmem:[#allocation3 + $0x18] sm:$0xff]  ;;  %s517_s21 = scalar_lea.vmem %s383_s1, 2048  ;;  %p522_p11 = scmp.lt.s32.totalorder %s383_s1, %s383_s1 }
  0x1f   :  { %467 = vmatpush3.msra.mxu1 %v83_v1  ;;  %433 = vmatprep.subr.mxu0 %v82_v2  ;;  %p518_p10 = scmp.ne.s32.totalorder %s383_s1, %s517_s21  ;;  %p523_p12 = scmp.lt.s32.totalorder %s517_s21, %s517_s21 }
  0x20   :  { %464 = vmatprep.subr.mxu1 %v82_v2  ;;  %434 = vmatpush3.msra.mxu0 %v82_v2 }
  0x21   :  { %85 = vxpose.xlu0.b32.cont [2/4] (short) %v77_v3, 128  ;;  %435 = vmatprep.subr.mxu0 %v81_v4  ;;  %p524_p13 = por %p523_p12, %p522_p11 }
  0x22   :  { %468 = vmatpush3.msra.mxu1 %v82_v2  ;;  %436 = vmatpush3.msra.mxu0 %v81_v4 }
  0x23   :  { %465 = vmatprep.subr.mxu1 %v81_v4  ;;  %437 = vmatprep.subr.mxu0 %v80_v5  ;;  %p525_p0 = pnand %p524_p13, %p518_p10 }
  0x24   :  { %469 = vmatpush3.msra.mxu1 %v81_v4  ;;  %438 = vmatpush3.msra.mxu0 %v80_v5 }
  0x25   :  { %86 = vxpose.xlu0.b32.cont [3/4] (short) %v78_v6, 128  ;;  %466 = vmatprep.subr.mxu1 %v80_v5 }
  0x26   :  { %470 = vmatpush3.msra.mxu1 %v80_v5 }
  0x29   :  { %87 = vxpose.xlu0.b32.end [4/4] (short) %v79_v7, 128 }
  0x99   :  { %v100_v8 = vpop.trf.xlu0 }
  0x9a   :  { %439 = vmatprep.mubr.msk.f32.mxu0 %vm116_vm0, %v100_v8 }
  0x9d   :  { %v101_v9 = vpop.trf.xlu0 }
  0x9e   :  { %440 = vmatmul.mubr.msk.f32.vlgmr.msra.gmra.mxu0 %vm116_vm0, %v101_v9 }
  0xa1   :  { %v102_v10 = vpop.trf.xlu0 }
  0xa2   :  { %442 = vmatprep.mubr.msk.f32.mxu0 %vm116_vm0, %v102_v10 }
  0xa5   :  { %v103_v11 = vpop.trf.xlu0 }
  0xa6   :  { %443 = vmatmul.mubr.msk.f32.gmra.mxu0 %vm116_vm0, %v103_v11 }
  0xa9   :  { %v104_v12 = vpop.trf.xlu0 }
  0xaa   :  { %445 = vmatprep.mubr.msk.f32.mxu0 %vm116_vm0, %v104_v12 }
  0xad   :  { %v105_v13 = vpop.trf.xlu0 }
  0xae   :  { %446 = vmatmul.mubr.msk.f32.gmra.mxu0 %vm116_vm0, %v105_v13 }
  0xb1   :  { %v106_v14 = vpop.trf.xlu0 }
  0xb2   :  { %448 = vmatprep.mubr.msk.f32.mxu0 %vm116_vm0, %v106_v14 }
  0xb5   :  { %v107_v15 = vpop.trf.xlu0 }
  0xb6   :  { %449 = vmatmul.mubr.msk.f32.gmra.mxu0 %vm116_vm0, %v107_v15 }
  0xb9   :  { %v108_v16 = vpop.trf.xlu0 }
  0xba   :  { %451 = vmatprep.mubr.msk.f32.mxu1 %vm116_vm0, %v108_v16 }
  0xbd   :  { %v109_v17 = vpop.trf.xlu0 }
  0xbe   :  { %452 = vmatmul.mubr.msk.f32.vlgmr.msra.gmra.mxu1 %vm116_vm0, %v109_v17 }
  0xc1   :  { %v110_v18 = vpop.trf.xlu0 }
  0xc2   :  { %454 = vmatprep.mubr.msk.f32.mxu1 %vm116_vm0, %v110_v18 }
  0xc5   :  { %v111_v19 = vpop.trf.xlu0 }
  0xc6   :  { %455 = vmatmul.mubr.msk.f32.gmra.mxu1 %vm116_vm0, %v111_v19 }
  0xc9   :  { %v112_v20 = vpop.trf.xlu0 }
  0xca   :  { %457 = vmatprep.mubr.msk.f32.mxu1 %vm116_vm0, %v112_v20 }
  0xcd   :  { %v113_v21 = vpop.trf.xlu0 }
  0xce   :  { %458 = vmatmul.mubr.msk.f32.gmra.mxu1 %vm116_vm0, %v113_v21 }
  0xd1   :  { %v114_v22 = vpop.trf.xlu0 }
  0xd2   :  { %460 = vmatprep.mubr.msk.f32.mxu1 %vm116_vm0, %v114_v22 }
  0xd5   :  { %v115_v23 = vpop.trf.xlu0 }
  0xd6   :  { %461 = vmatmul.mubr.msk.f32.gmra.mxu1 %vm116_vm0, %v115_v23 }
 0x15e   :  { %v441_v24 = vpop.f32.mrf.mxu0 }
 0x15f   :  { %362 = vst [vmem:[#allocation8 + $0x8] sm:$0xff] %v441_v24 }
 0x160   :  { %v231_v25 = vpop.f32.mrf.mxu0 }
 0x161   :  { %361 = vst [vmem:[#allocation8] sm:$0xff] %v231_v25 }
 0x166   :  { %v444_v26 = vpop.f32.mrf.mxu0 }
 0x167   :  { %364 = vst [vmem:[#allocation8 + $0x18] sm:$0xff] %v444_v26 }
 0x168   :  { %v241_v27 = vpop.f32.mrf.mxu0 }
 0x169   :  { %363 = vst [vmem:[#allocation8 + $0x10] sm:$0xff] %v241_v27 }
 0x16e   :  { %v447_v28 = vpop.f32.mrf.mxu0 }
 0x16f   :  { %366 = vst [vmem:[#allocation8 + $0x28] sm:$0xff] %v447_v28 }
 0x170   :  { %v251_v29 = vpop.f32.mrf.mxu0 }
 0x171   :  { %365 = vst [vmem:[#allocation8 + $0x20] sm:$0xff] %v251_v29 }
 0x176   :  { %v450_v30 = vpop.f32.mrf.mxu0 }
 0x177   :  { %368 = vst [vmem:[#allocation8 + $0x38] sm:$0xff] %v450_v30 }
 0x178   :  { %v261_v31 = vpop.f32.mrf.mxu0 }
 0x179   :  { %367 = vst [vmem:[#allocation8 + $0x30] sm:$0xff] %v261_v31 }
 0x17e   :  { %v453_v32 = vpop.f32.mrf.mxu1 }
 0x17f   :  { %370 = vst [vmem:[#allocation8 + $0x48] sm:$0xff] %v453_v32 }
 0x180   :  { %v271_v33 = vpop.f32.mrf.mxu1 }
 0x181   :  { %369 = vst [vmem:[#allocation8 + $0x40] sm:$0xff] %v271_v33 }
 0x186   :  { %v456_v34 = vpop.f32.mrf.mxu1 }
 0x187   :  { %372 = vst [vmem:[#allocation8 + $0x58] sm:$0xff] %v456_v34 }
 0x188   :  { %v281_v35 = vpop.f32.mrf.mxu1 }
 0x189   :  { %371 = vst [vmem:[#allocation8 + $0x50] sm:$0xff] %v281_v35 }
 0x18e   :  { %v459_v36 = vpop.f32.mrf.mxu1 }
 0x18f   :  { %374 = vst [vmem:[#allocation8 + $0x68] sm:$0xff] %v459_v36 }
 0x190   :  { %v291_v37 = vpop.f32.mrf.mxu1 }
 0x191   :  { %373 = vst [vmem:[#allocation8 + $0x60] sm:$0xff] %v291_v37 }
 0x196   :  { %v462_v38 = vpop.f32.mrf.mxu1 }
 0x197   :  { %376 = vst [vmem:[#allocation8 + $0x78] sm:$0xff] %v462_v38 }
 0x198   :  { %v301_v39 = vpop.f32.mrf.mxu1 }
 0x199   :  { %375 = vst [vmem:[#allocation8 + $0x70] sm:$0xff] %v301_v39 }
 0x19a   :  { %528 = shalt.err (!%p525_p0)
}
 0x19b   :  { %388 = dma.vmem_to_hbm [thread:$0]  %s383_s1, 2048, %s599_s2, [#allocation5], %s544_s12, %s544_s12, %s545_s13  }
 0x19c   :  { %541 = dma.done.wait [#allocation5], 2048  }
 0x19d   :  { %542 = vsyncadd [#allocation5], 4294965248 }
 0x19e   :  { %392 = vsyncpa [#allocation4], 1 }
 0x19f   :  { %393 = vsyncpa [#allocation7], 1 }
 0x1a0   :  { %394 = vsyncpa [#allocation5], 1 }

</bundles_post_ra>
